<compile_context>
chip_gen: v7x
topology: tpu7x:2x2x1
jax: 0.10.0
libtpu: 0.0.40
codegen_flags: <defaults>
</compile_context>

<pallas_src>
import functools
import math

import numpy as np
import jax
import jax.numpy as jnp
from jax.experimental import pallas as pl
from jax.experimental.pallas import tpu as pltpu


# ----------------------------------------------------------------------------
# init-time scalar helpers (plain Python, only used when tilt is not None)
# ----------------------------------------------------------------------------
def _kummer_M(a, b, x, terms=256):
    """Confluent hypergeometric 1F1(a; b; x) via power series (scalar)."""
    s = 1.0
    term = 1.0
    for k in range(1, terms):
        term *= (a + k - 1.0) / (b + k - 1.0) * x / k
        s += term
        if abs(term) < 1e-16 * abs(s):
            break
    return s


def _compute_z_tilt(nz, tilt):
    return (_kummer_M(nz / 2.0, 0.5, tilt ** 2 / 2.0)
            + tilt * math.sqrt(2.0)
            * math.gamma((nz + 1) / 2.0) / math.gamma(nz / 2.0)
            * _kummer_M((nz + 1) / 2.0, 1.5, tilt ** 2 / 2.0))


# ----------------------------------------------------------------------------
# tile-size helpers (respect the (8, 128) BlockSpec constraint)
# ----------------------------------------------------------------------------
def _choose_tb(B, max_tb=256):
    """Batch tile: multiple of 8 dividing B (<= max_tb); else full B.

    Additionally caps TB at B//2 (when B >= 16) so the parallel batch axis
    always has >= 2 grid steps and can be sharded across two TensorCores.
    """
    if B < 8 or B % 8 != 0:
        return B                       # block dim == full array dim is legal
    limit = min(B, max_tb)
    if B >= 16:
        limit = min(limit, B // 2)     # guarantee >= 2 i-steps (megacore)
    tb = limit - (limit % 8)
    while tb >= 8 and B % tb != 0:
        tb -= 8
    return tb if tb >= 8 else B


def _choose_td(D, max_td=4096):
    """D tile: lane-aligned (multiple of 128) tile near max_td.

    TD does not need to divide D: the grid uses cdiv(D, TD) and the kernel
    masks the overhang of the ragged last tile before accumulating.
    """
    max_td = max(128, (max_td // 128) * 128)
    if D <= 128:
        return 128 if D % 128 == 0 else D   # full-dim fallback for tiny D
    td_full = ((D + 127) // 128) * 128      # D rounded up to a lane multiple
    return min(max_td, td_full)


# ----------------------------------------------------------------------------
# Pallas kernel
# ----------------------------------------------------------------------------
def _compute_weight_kernel(x_ref, xo_ref, mu_ref, lv_ref, z_ref, out_ref,
                           acc_ref, *, nz, tilt, log_z_tilt, D, TD, ragged):
    k = pl.program_id(1)

    @pl.when(k == 0)
    def _():
        acc_ref[...] = jnp.zeros_like(acc_ref)

    # Streaming phase: squared-diff + a single cross-lane reduce per step.
    # The XLU reduce is a free slot in this HBM-bandwidth-bound kernel; the
    # resident accumulator is only (TB, 1) f32, leaving VMEM for big tiles.
    diff = x_ref[...].astype(jnp.float32) - xo_ref[...].astype(jnp.float32)
    sq = diff * diff
    if ragged:
        # Ragged last D tile: zero lanes past the true feature dim D.
        col = k * TD + jax.lax.broadcasted_iota(jnp.int32, sq.shape, 1)
        sq = jnp.where(col < D, sq, 0.0)
    acc_ref[...] += jnp.sum(sq, axis=1, keepdims=True)              # (TB, 1)

    @pl.when(k == pl.num_programs(1) - 1)
    def _():
        # log p(x|z) = -|| x - x_out ||_F  (per batch row)
        log_p_x_z = -jnp.sqrt(acc_ref[...])                          # (TB, 1)

        # log p(z)
        z = z_ref[...].astype(jnp.float32)                           # (TB, nz)
        z_sq = jnp.sum(z * z, axis=1, keepdims=True)                 # (TB, 1)
        log_p_z = -0.5 * z_sq - jnp.float32((nz / 2.0) * np.log(2.0 * np.pi))
        if tilt is not None:
            log_p_z = (log_p_z + jnp.float32(tilt) * jnp.sqrt(z_sq)
                       - jnp.float32(log_z_tilt))

        # log q(z|x)
        lv = lv_ref[...].astype(jnp.float32)                         # (TB, nz)
        mu = mu_ref[...].astype(jnp.float32)                         # (TB, nz)
        z_eps = (z - mu) * jnp.exp(-0.5 * lv)
        const = jnp.float32(0.5 * np.log(2.0 * np.pi) + 0.5 * np.log(nz))
        log_q_z_x = -jnp.sum(0.5 * z_eps * z_eps + 0.5 * lv + const,
                             axis=1, keepdims=True)                  # (TB, 1)

        out_ref[...] = log_p_x_z + log_p_z - log_q_z_x


# ----------------------------------------------------------------------------
# Wrapper (glue: reshape / spec plumbing; no dtype up-cast here)
# ----------------------------------------------------------------------------
def compute_weight(x, x_out, mu, log_var, z, *, loss_type='l2', tilt=None,
                   max_tb=256, max_td=4096, vmem_limit_bytes=48 * 1024 * 1024):
    if loss_type != 'l2':
        # TODO(synk): cross_entropy loss path not implemented in Pallas here.
        raise NotImplementedError("only loss_type='l2' is implemented")

    B = x.shape[0]
    nz = z.shape[1]
    x_flat = x.reshape(B, -1)          # native dtype; cast happens in-kernel
    xo_flat = x_out.reshape(B, -1)
    D = x_flat.shape[1]

    TB = _choose_tb(B, max_tb)
    TD = _choose_td(D, max_td)
    grid = (pl.cdiv(B, TB), pl.cdiv(D, TD))
    ragged = (D % TD) != 0             # static: fast path has no masking at all

    log_z_tilt = float(np.log(_compute_z_tilt(nz, tilt))) if tilt is not None else 0.0

    kernel = functools.partial(_compute_weight_kernel,
                               nz=nz, tilt=tilt, log_z_tilt=log_z_tilt,
                               D=D, TD=TD, ragged=ragged)

    itemsize = np.dtype(x_flat.dtype).itemsize
    lat_itemsize = np.dtype(z.dtype).itemsize
    cost = pl.CostEstimate(
        flops=3 * B * D + 12 * B * nz,
        transcendentals=B * (nz + 2),
        bytes_accessed=2 * B * D * itemsize + 3 * B * nz * lat_itemsize + B * 4,
    )

    out = pl.pallas_call(
        kernel,
        out_shape=jax.ShapeDtypeStruct((B, 1), jnp.float32),
        grid_spec=pltpu.PrefetchScalarGridSpec(
            num_scalar_prefetch=0,
            grid=grid,
            in_specs=[
                # streamed image tiles (double-buffered by BlockSpec)
                pl.BlockSpec((TB, TD), lambda i, k: (i, k)),
                pl.BlockSpec((TB, TD), lambda i, k: (i, k)),
                # latents: constant in k -> resident, no re-DMA across D steps
                pl.BlockSpec((TB, nz), lambda i, k: (i, 0)),
                pl.BlockSpec((TB, nz), lambda i, k: (i, 0)),
                pl.BlockSpec((TB, nz), lambda i, k: (i, 0)),
            ],
            out_specs=pl.BlockSpec((TB, 1), lambda i, k: (i, 0)),
            # (TB, 1) f32 accumulator: tiny, leaves VMEM for big input tiles.
            scratch_shapes=[pltpu.VMEM((TB, 1), jnp.float32)],
        ),
        compiler_params=pltpu.CompilerParams(
            dimension_semantics=("parallel", "arbitrary"),
            vmem_limit_bytes=vmem_limit_bytes),
        cost_estimate=cost,
    )(x_flat, xo_flat, mu, log_var, z)

    return out[:, 0]


# ----------------------------------------------------------------------------
# Pure-JAX reference (mirrors the PyTorch forward) for a correctness check.
# ----------------------------------------------------------------------------
def _reference(x, x_out, mu, log_var, z, *, tilt=None):
    B = x.shape[0]
    nz = z.shape[1]
    log_p_x_z = -jnp.linalg.norm((x - x_out).reshape(B, -1), axis=1)
    log_p_z = -jnp.sum(z ** 2 / 2.0, axis=1) - nz / 2.0 * np.log(2.0 * np.pi)
    if tilt is not None:
        z_tilt = _compute_z_tilt(nz, tilt)
        log_p_z = log_p_z + tilt * jnp.linalg.norm(z, axis=1) - np.log(z_tilt)
    z_eps = (z - mu) / jnp.exp(0.5 * log_var)
    log_q_z_x = -jnp.sum(z_eps ** 2 / 2.0 + np.log(2.0 * np.pi) / 2.0
                         + log_var / 2.0 + np.log(nz) / 2.0, axis=1)
    return log_p_x_z + log_p_z - log_q_z_x


if __name__ == "__main__":
    B, C, H, W = 2, 4, 16, 16
    nz = 8

    key = jax.random.PRNGKey(0)
    k1, k2, k3, k4, k5 = jax.random.split(key, 5)
    x = jax.random.uniform(k1, (B, C, H, W), dtype=jnp.float32)       # NCHW
    x_out = jax.random.uniform(k2, (B, C, H, W), dtype=jnp.float32)   # NCHW
    mu = jax.random.normal(k3, (B, nz), dtype=jnp.float32)
    log_var = 0.1 * jax.random.normal(k4, (B, nz), dtype=jnp.float32)
    z = jax.random.normal(k5, (B, nz), dtype=jnp.float32)

    # D = C*H*W = 1024; max_td=512 forces 2 D-steps so the resident
    # (TB,1) accumulator / init-finalize path is exercised.

    # tilt=None case (standard Gaussian prior)
    out = compute_weight(x, x_out, mu, log_var, z, loss_type='l2',
                         tilt=None, max_td=512)
    out = jax.block_until_ready(out)
    ref = _reference(x, x_out, mu, log_var, z, tilt=None)
    assert jnp.allclose(out, ref, rtol=1e-4, atol=1e-4), (out, ref)

    # tilted prior case
    out_t = compute_weight(x, x_out, mu, log_var, z, loss_type='l2',
                           tilt=2.0, max_td=512)
    out_t = jax.block_until_ready(out_t)
    ref_t = _reference(x, x_out, mu, log_var, z, tilt=2.0)
    assert jnp.allclose(out_t, ref_t, rtol=1e-4, atol=1e-4), (out_t, ref_t)

    # ragged-D case: D = 3*10*10 = 300, TD=256 -> 2 D-steps, last one masked.
    xr = jax.random.uniform(k1, (B, 3, 10, 10), dtype=jnp.float32)
    xr_out = jax.random.uniform(k2, (B, 3, 10, 10), dtype=jnp.float32)
    out_r = compute_weight(xr, xr_out, mu, log_var, z, loss_type='l2',
                           tilt=None, max_td=256)
    out_r = jax.block_until_ready(out_r)
    ref_r = _reference(xr, xr_out, mu, log_var, z, tilt=None)
    assert jnp.allclose(out_r, ref_r, rtol=1e-4, atol=1e-4), (out_r, ref_r)

    print("KERNEL_OK")
</pallas_src>

<mosaic_0001>
module attributes {stable_mosaic.version = 11 : i64} {
  func.func @_compute_weight_kernel(%arg0: i32, %arg1: i32, %arg2: memref<2x512xf32, #tpu.memory_space<vmem>>, %arg3: memref<2x512xf32, #tpu.memory_space<vmem>>, %arg4: memref<2x8xf32, #tpu.memory_space<vmem>>, %arg5: memref<2x8xf32, #tpu.memory_space<vmem>>, %arg6: memref<2x8xf32, #tpu.memory_space<vmem>>, %arg7: memref<2x1xf32, #tpu.memory_space<vmem>>, %arg8: memref<2x1xf32, #tpu.memory_space<vmem>>) attributes {dimension_semantics = [#tpu.dimension_semantics<parallel>, #tpu.dimension_semantics<arbitrary>], iteration_bounds = array<i64: 1, 2>, scalar_prefetch = 0 : i64, scratch_operands = 1 : i64, tpu.core_type = #tpu.core_type<tc>, window_params = [{transform_indices = @transform_0, window_bounds = array<i64: 2, 512>}, {transform_indices = @transform_1, window_bounds = array<i64: 2, 512>}, {transform_indices = @transform_2, window_bounds = array<i64: 2, 8>}, {transform_indices = @transform_3, window_bounds = array<i64: 2, 8>}, {transform_indices = @transform_4, window_bounds = array<i64: 2, 8>}, {transform_indices = @transform_5, window_bounds = array<i64: 2, 1>}]} {
    %c0_i32 = arith.constant 0 : i32
    %0 = arith.cmpi eq, %arg1, %c0_i32 : i32
    %1 = arith.extui %0 : i1 to i32
    %c0_i32_0 = arith.constant 0 : i32
    %2 = arith.cmpi ne, %1, %c0_i32_0 : i32
    scf.if %2 {
      %cst_9 = arith.constant 0.000000e+00 : f32
      %15 = vector.broadcast %cst_9 : f32 to vector<2x1xf32>
      %c0_10 = arith.constant 0 : index
      %c0_11 = arith.constant 0 : index
      %16 = vector.load %arg8[%c0_10, %c0_11] : memref<2x1xf32, #tpu.memory_space<vmem>>, vector<2x1xf32>
      tpu.vector_store %arg8[%c0_10, %c0_11], %15 {strides = array<i32>} : memref<2x1xf32, #tpu.memory_space<vmem>>, vector<2x1xf32>,
    } else {
    }
    %c0 = arith.constant 0 : index
    %c0_1 = arith.constant 0 : index
    %3 = vector.load %arg2[%c0, %c0_1] : memref<2x512xf32, #tpu.memory_space<vmem>>, vector<2x512xf32>
    %c0_2 = arith.constant 0 : index
    %c0_3 = arith.constant 0 : index
    %4 = vector.load %arg3[%c0_2, %c0_3] : memref<2x512xf32, #tpu.memory_space<vmem>>, vector<2x512xf32>
    %5 = arith.subf %3, %4 : vector<2x512xf32>
    %6 = arith.mulf %5, %5 : vector<2x512xf32>
    %c0_4 = arith.constant 0 : index
    %c0_5 = arith.constant 0 : index
    %7 = vector.load %arg8[%c0_4, %c0_5] : memref<2x1xf32, #tpu.memory_space<vmem>>, vector<2x1xf32>
    %cst = arith.constant dense<0.000000e+00> : vector<2xf32>
    %8 = vector.multi_reduction <add>, %6, %cst [1] : vector<2x512xf32> to vector<2xf32>
    %9 = vector.shape_cast %8 : vector<2xf32> to vector<2x1xf32>
    %10 = arith.addf %7, %9 : vector<2x1xf32>
    %c0_6 = arith.constant 0 : index
    %c0_7 = arith.constant 0 : index
    %11 = vector.load %arg8[%c0_6, %c0_7] : memref<2x1xf32, #tpu.memory_space<vmem>>, vector<2x1xf32>
    tpu.vector_store %arg8[%c0_6, %c0_7], %10 {strides = array<i32>} : memref<2x1xf32, #tpu.memory_space<vmem>>, vector<2x1xf32>,
    %c1_i32 = arith.constant 1 : i32
    %12 = arith.cmpi eq, %arg1, %c1_i32 : i32
    %13 = arith.extui %12 : i1 to i32
    %c0_i32_8 = arith.constant 0 : i32
    %14 = arith.cmpi ne, %13, %c0_i32_8 : i32
    scf.if %14 {
      %c0_9 = arith.constant 0 : index
      %c0_10 = arith.constant 0 : index
      %15 = vector.load %arg8[%c0_9, %c0_10] : memref<2x1xf32, #tpu.memory_space<vmem>>, vector<2x1xf32>
      %16 = math.sqrt %15 : vector<2x1xf32>
      %cst_11 = arith.constant 0.000000e+00 : f32
      %17 = vector.broadcast %cst_11 : f32 to vector<2x1xf32>
      %18 = arith.subf %17, %16 : vector<2x1xf32>
      %c0_12 = arith.constant 0 : index
      %c0_13 = arith.constant 0 : index
      %19 = vector.load %arg6[%c0_12, %c0_13] : memref<2x8xf32, #tpu.memory_space<vmem>>, vector<2x8xf32>
      %20 = arith.mulf %19, %19 : vector<2x8xf32>
      %cst_14 = arith.constant dense<0.000000e+00> : vector<2xf32>
      %21 = vector.multi_reduction <add>, %20, %cst_14 [1] : vector<2x8xf32> to vector<2xf32>
      %22 = vector.shape_cast %21 : vector<2xf32> to vector<2x1xf32>
      %cst_15 = arith.constant -5.000000e-01 : f32
      %23 = vector.broadcast %cst_15 : f32 to vector<2x1xf32>
      %24 = arith.mulf %23, %22 : vector<2x1xf32>
      %cst_16 = arith.constant 7.35150814 : f32
      %25 = vector.broadcast %cst_16 : f32 to vector<2x1xf32>
      %26 = arith.subf %24, %25 : vector<2x1xf32>
      %c0_17 = arith.constant 0 : index
      %c0_18 = arith.constant 0 : index
      %27 = vector.load %arg5[%c0_17, %c0_18] : memref<2x8xf32, #tpu.memory_space<vmem>>, vector<2x8xf32>
      %c0_19 = arith.constant 0 : index
      %c0_20 = arith.constant 0 : index
      %28 = vector.load %arg4[%c0_19, %c0_20] : memref<2x8xf32, #tpu.memory_space<vmem>>, vector<2x8xf32>
      %29 = arith.subf %19, %28 : vector<2x8xf32>
      %cst_21 = arith.constant -5.000000e-01 : f32
      %30 = vector.broadcast %cst_21 : f32 to vector<2x8xf32>
      %31 = arith.mulf %30, %27 : vector<2x8xf32>
      %32 = math.exp %31 : vector<2x8xf32>
      %33 = arith.mulf %29, %32 : vector<2x8xf32>
      %cst_22 = arith.constant 5.000000e-01 : f32
      %34 = vector.broadcast %cst_22 : f32 to vector<2x8xf32>
      %35 = arith.mulf %34, %33 : vector<2x8xf32>
      %36 = arith.mulf %35, %33 : vector<2x8xf32>
      %cst_23 = arith.constant 5.000000e-01 : f32
      %37 = vector.broadcast %cst_23 : f32 to vector<2x8xf32>
      %38 = arith.mulf %37, %27 : vector<2x8xf32>
      %39 = arith.addf %36, %38 : vector<2x8xf32>
      %cst_24 = arith.constant 1.95865929 : f32
      %40 = vector.broadcast %cst_24 : f32 to vector<2x8xf32>
      %41 = arith.addf %39, %40 : vector<2x8xf32>
      %cst_25 = arith.constant dense<0.000000e+00> : vector<2xf32>
      %42 = vector.multi_reduction <add>, %41, %cst_25 [1] : vector<2x8xf32> to vector<2xf32>
      %43 = vector.shape_cast %42 : vector<2xf32> to vector<2x1xf32>
      %cst_26 = arith.constant 0.000000e+00 : f32
      %44 = vector.broadcast %cst_26 : f32 to vector<2x1xf32>
      %45 = arith.subf %44, %43 : vector<2x1xf32>
      %46 = arith.addf %18, %26 : vector<2x1xf32>
      %47 = arith.subf %46, %45 : vector<2x1xf32>
      %c0_27 = arith.constant 0 : index
      %c0_28 = arith.constant 0 : index
      %48 = vector.load %arg7[%c0_27, %c0_28] : memref<2x1xf32, #tpu.memory_space<vmem>>, vector<2x1xf32>
      tpu.vector_store %arg7[%c0_27, %c0_28], %47 {strides = array<i32>} : memref<2x1xf32, #tpu.memory_space<vmem>>, vector<2x1xf32>,
    } else {
    }
    return
  }
  func.func @transform_0(%arg0: i32, %arg1: i32) -> (i32, i32) {
    %c0_i32 = arith.constant 0 : i32
    return %arg0, %arg1 : i32, i32
  }
  func.func @transform_1(%arg0: i32, %arg1: i32) -> (i32, i32) {
    %c0_i32 = arith.constant 0 : i32
    return %arg0, %arg1 : i32, i32
  }
  func.func @transform_2(%arg0: i32, %arg1: i32) -> (i32, i32) {
    %c0_i32 = arith.constant 0 : i32
    %c0_i32_0 = arith.constant 0 : i32
    return %arg0, %c0_i32 : i32, i32
  }
  func.func @transform_3(%arg0: i32, %arg1: i32) -> (i32, i32) {
    %c0_i32 = arith.constant 0 : i32
    %c0_i32_0 = arith.constant 0 : i32
    return %arg0, %c0_i32 : i32, i32
  }
  func.func @transform_4(%arg0: i32, %arg1: i32) -> (i32, i32) {
    %c0_i32 = arith.constant 0 : i32
    %c0_i32_0 = arith.constant 0 : i32
    return %arg0, %c0_i32 : i32, i32
  }
  func.func @transform_5(%arg0: i32, %arg1: i32) -> (i32, i32) {
    %c0_i32 = arith.constant 0 : i32
    %c0_i32_0 = arith.constant 0 : i32
    return %arg0, %c0_i32 : i32, i32
  }
}

</mosaic_0001>

<bundles_post_ra>
// kernel: tpu_custom_call.1
= control target key start
LH: loop header
LB: loop body
LE: loop exit
PB: predicated region body
PF: predicated region fallthrough
CT: control target
= control target key end

     0   :  { %10 = vsyncpa [#allocation4], 0  ;;  %s1006_s0 = inlined_call_operand.hbm [shape: f32[2,1024], index: 0, kind: input, shape index: {}]   ;;  %s1007_s1 = inlined_call_operand.hbm [shape: f32[2,1024], index: 1, kind: input, shape index: {}]   ;;  %s1008_s2 = inlined_call_operand.vmem [shape: f32[2,8], index: 2, kind: input, shape index: {}]   ;;  %s1009_s3 = inlined_call_operand.vmem [shape: f32[2,8], index: 3, kind: input, shape index: {}]   ;;  %s1010_s4 = inlined_call_operand.vmem [shape: f32[2,8], index: 4, kind: input, shape index: {}]   ;;  %s1011_s5 = inlined_call_operand.vmem [shape: f32[2,1], index: 5, kind: output, shape index: {}]  }
   0x1   :  { %12 = vsyncpa [#allocation4 + $0x1], 0 }
   0x2   :  { %13 = vsyncpa [#allocation6], 0 }
   0x3   :  { %15 = vsyncpa [#allocation6 + $0x1], 0  ;;  %s821_s18 = smov 0   ;;  %s823_s19 = smov 0  }
   0x4   :  { %s825_s20 = smov 0   ;;  %s827_s21 = smov 0  }
   0x5   :  { %s829_s22 = smov 0   ;;  %s831_s23 = smov 0  }
   0x6 LB: > { %s582_s24 = sadd.s32 4294967295, %s785_s23   ;;  %s30_s25 = sadd.s32 1, %s781_s22  ;;  %s785_s23 = sphi %s831_s23, %s21_s23   ;;  %s781_s22 = sphi %s829_s22, %s1025_s22   ;;  %s777_s21 = sphi %s827_s21, %s1024_s21   ;;  %s773_s20 = sphi %s825_s20, %s1023_s20   ;;  %s769_s19 = sphi %s823_s19, %s1022_s19   ;;  %s765_s18 = sphi %s821_s18, %s1021_s18  }
   0x7   : > { %p31_p0 = scmp.ge.s32.totalorder %s30_s25, 2  ;;  %s42_s26 = sadd.s32 1, %s773_s20 }
   0x8   : > { %p49_p1 = scmp.ne.s32.totalorder %s773_s20, %s769_s19  ;;  %p50_p2 = scmp.eq.s32.totalorder %s785_s23, 0 }
   0x9   : > { %s1027_s25 = smov (%p31_p0, %s30_s25), 0  ;;  %p55_p4 = scmp.ne.s32.totalorder %s769_s19, %s765_s18 }
   0xa   : > { %p857_p3 = por %p50_p2, %p49_p1  ;;  %s38_s28 = ssub.s32 %s781_s22, %s1027_s25 }
   0xb   : > { %p56_p5 = scmp.eq.s32.totalorder %s582_s24, 0  ;;  %p40_p6 = scmp.eq.s32.totalorder %s38_s28, 0 }
   0xc   : > { %p616_p8 = scmp.lt.s32.totalorder %s785_s23, 2  ;;  %s873_s6 = sand.u32 1, %s773_s20  }
   0xd   : > { %p864_p7 = por %p56_p5, %p55_p4  ;;  %s603_s7 = sshll.u32 %s781_s22, 7 }
   0xe   : > { %s870_s30 = scalar_select %p40_p6, %s773_s20, %s42_s26  }
   0xf   : > { %s1014_s29 = scalar_select %p864_p7, 1, 0 }
  0x10   : > { %s588_s8 = sshll.u32 %s873_s6, 3  ;;  %s882_s11 = scalar_lea.hbm %s1006_s0, %s603_s7 }
  0x11   : > { %s236_s12 = scalar_lea.vmem [#allocation3], %s588_s8  ;;  %p888_p9 = pnand %p616_p8, %p857_p3 }
  0x12   : > { %s246_s13 = sshll.u32 %s236_s12, 4  ;;  %s233_s15 = scalar_lea.sflag [#allocation4], %s873_s6  ;;  %s892_s13 = int_to_ptr.vmem [resolvable:$true] %s246_s13 }
  0x13   : > { %s671_s16 = scalar_lea.hbm %s882_s11, 128  ;;  %p673_p13 = pneg %p888_p9 }
  0x14   : > { %p672_p12 = scmp.ne.s32.totalorder %s882_s11, %s671_s16  ;;  %s676_s24 = scalar_lea.hbm %s1006_s0, 256 }
  0x15   : > { %p677_p2 = scmp.lt.u32.totalorder %s882_s11, %s1006_s0  ;;  %p678_p3 = scmp.lt.u32.totalorder %s676_s24, %s671_s16 }
  0x16   : > { %p674_p0 = pnand %p673_p13, %p672_p12  ;;  %p680_p5 = scmp.lt.u32.totalorder %s671_s16, %s882_s11 }
  0x17   : > { %p679_p4 = por %p678_p3, %p677_p2 }
  0x18   : > { %p675_p1 = pneg %p674_p0 }
  0x19   : > { %p681_p6 = por %p680_p5, %p679_p4 }
  0x1b   : > { %p682_p8 = pnand %p681_p6, %p675_p1 }
  0x1d   : > { %685 = shalt.err (!%p682_p8)
}
  0x1e   : > { %s686_s28 = scalar_lea.vmem %s892_s13, 128  ;;  %s787_s9 = smov [#allocation3]  }
  0x1f   : > { %p687_p12 = scmp.ne.s32.totalorder %s892_s13, %s686_s28  ;;  %s691_s10 = sshll.u32 %s787_s9, 4  ;;  %s692_s10 = int_to_ptr.vmem [resolvable:$false] %s691_s10 }
  0x20   : > { %s693_s12 = scalar_lea.vmem %s692_s10, 256  ;;  %p694_p11 = scmp.lt.s32.totalorder %s892_s13, %s692_s10 }
  0x21   : > { %p689_p0 = pnand %p687_p12, %p673_p13  ;;  %p695_p2 = scmp.lt.s32.totalorder %s693_s12, %s686_s28 }
  0x23   : > { %p690_p10 = pneg %p689_p0  ;;  %p696_p3 = por %p695_p2, %p694_p11 }
  0x25   : > { %p697_p4 = pnand %p696_p3, %p690_p10 }
  0x27   : > { %700 = shalt.err (!%p697_p4)
}
  0x28   : > { %612 = dma.hbm_to_vmem [thread:$0]  (!%p888_p9), %s882_s11, 128, %s892_s13, %s233_s15  }
  0x29   : > { %p1016_p1 = scmp.lt.s32.totalorder %s785_s23, 3  ;;  %p1017_p5 = scmp.ge.s32.totalorder %s785_s23, 1 }
  0x2a   : > { %s935_s24 = scalar_lea.hbm %s1007_s1, %s603_s7  ;;  %s257_s26 = scalar_lea.vmem [#allocation5], %s588_s8 }
  0x2b   : > { %p926_p6 = pnand %p1017_p5, %p1016_p1  ;;  %s267_s27 = sshll.u32 %s257_s26, 4  ;;  %s268_s27 = int_to_ptr.vmem [resolvable:$true] %s267_s27 }
  0x2c   : > { %s254_s11 = scalar_lea.sflag [#allocation6], %s873_s6  ;;  %s701_s13 = scalar_lea.hbm %s935_s24, 128 }
  0x2d   : > { %s1018_s16 = scalar_select %p926_p6, 1, 0 }
  0x2e   : > { %p702_p10 = scmp.ne.s32.totalorder %s935_s24, %s701_s13  ;;  %s706_s7 = scalar_lea.hbm %s1007_s1, 256 }
  0x2f   : > { %p707_p12 = scmp.lt.u32.totalorder %s935_s24, %s1007_s1  ;;  %p708_p0 = scmp.lt.u32.totalorder %s706_s7, %s701_s13 }
  0x30   : > { %p704_p11 = pnand %p702_p10, %p673_p13  ;;  %p710_p3 = scmp.lt.u32.totalorder %s701_s13, %s935_s24 }
  0x31   : > { %p709_p2 = por %p708_p0, %p707_p12 }
  0x32   : > { %p705_p8 = pneg %p704_p11 }
  0x33   : > { %p711_p4 = por %p710_p3, %p709_p2 }
  0x35   : > { %p712_p1 = pnand %p711_p4, %p705_p8 }
  0x37   : > { %715 = shalt.err (!%p712_p1)
}
  0x38   : > { %s716_s6 = scalar_lea.vmem %s268_s27, 128  ;;  %s788_s8 = smov [#allocation5]  }
  0x39   : > { %p717_p5 = scmp.ne.s32.totalorder %s268_s27, %s716_s6  ;;  %s721_s12 = sshll.u32 %s788_s8, 4  ;;  %s722_s12 = int_to_ptr.vmem [resolvable:$false] %s721_s12 }
  0x3a   : > { %s723_s17 = scalar_lea.vmem %s722_s12, 256  ;;  %p724_p7 = scmp.lt.s32.totalorder %s268_s27, %s722_s12 }
  0x3b   : > { %p719_p10 = pnand %p717_p5, %p673_p13  ;;  %p725_p6 = scmp.lt.s32.totalorder %s723_s17, %s716_s6 }
  0x3d   : > { %p720_p11 = pneg %p719_p10  ;;  %p726_p0 = por %p725_p6, %p724_p7 }
  0x3f   : > { %p727_p12 = pnand %p726_p0, %p720_p11 }
  0x41   : > { %730 = shalt.err (!%p727_p12)
}
  0x42   : > { %615 = dma.hbm_to_vmem [thread:$0]  (!%p888_p9), %s935_s24, 128, %s268_s27, %s254_s11  }
  0x43   : > { %p1019_p8 = scmp.ne.s32.totalorder %s1018_s16, 0 }
  0x44   : > { %s278_s18 = sand.u32 (!%p1019_p8), 1, %s769_s19   ;;  %p1020_p13 = scmp.ne.s32.totalorder (!%p1019_p8), %s1014_s29, 0 }
  0x45   : > { %276 = sbr.rel (%p1019_p8) target bundleno = 280 (0x118), region = 40  ;;  %s595_s26 = sshll.u32 (!%p1019_p8), %s278_s18, 3 }
  0x46   : > { %s279_s13 = scalar_lea.sflag (!%p1019_p8), [#allocation4], %s278_s18  ;;  %s282_s15 = scalar_lea.vmem (!%p1019_p8), [#allocation3], %s595_s26 }
  0x4c   : > { %756 = dma.done.wait (%p1020_p13), %s279_s13, 128  }
  0x4d   : > { %758 = vsyncadd (%p1020_p13), %s279_s13, 4294967168  ;;  %s288_s28 = scalar_lea.sflag [#allocation6], %s278_s18  ;;  %s291_s7 = scalar_lea.vmem [#allocation5], %s595_s26 }
  0x4e   : > { %760 = dma.done.wait (%p1020_p13), %s288_s28, 128  }
  0x4f   : > { %762 = vsyncadd (%p1020_p13), %s288_s28, 4294967168  ;;  %p597_p7 = scmp.ne.s32.totalorder %s777_s21, 0 }
  0x50   : > { %vm356_vm0 = vcmask (!%p597_p7), 1024   ;;  %v789_v0 = vmov (!%p597_p7), 0.0  }
  0x51   : > { %355 = sbr.rel (%p597_p7) target bundleno = 88 (0x58), region = 52  ;;  %357 = vst.msk [vmem:[#allocation2] sm:$0x3] (!%p597_p7), %vm356_vm0, %v789_v0 }
  0x58 PF: > { %v358_v1 = vld [vmem:[%s282_s15] sm:$0xff]  ;;  %v359_v2 = vld [vmem:[%s291_s7] sm:$0xff]  ;;  %v368_v3 = vlaneseq  ;;  %v790_v5 = vmov 1983009808   ;;  %vm385_vm1 = vcmask 1041408   ;;  %vm396_vm2 = vcmask 1024  }
  0x59   : > { %v360_v4 = vsub.f32 %v358_v1, %v359_v2  ;;  %v366_v6 = vunpack.c.l.s4 %v790_v5  ;;  %v362_v23 = vld [vmem:[#allocation2] sm:$0x3]  ;;  %p598_p9 = scmp.ne.s32.totalorder %s777_s21, 1 }
  0x5a   : > { %v369_v7 = vshrl.u32 %v368_v3, 7  ;;  %v411_v26 = vld [vmem:[%s1010_s4] sm:$0x3] (!%p598_p9)  ;;  %vm413_vm3 = vcmask (!%p598_p9), 58368  }
  0x5b   : > { %v361_v8 = vmul.f32 %v360_v4, %v360_v4  ;;  %v367_v9 = vunpack.c.0.s8 %v366_v6  ;;  %v419_v27 = vld [vmem:[%s1009_s3] sm:$0x3] (!%p598_p9)  ;;  %v412_v28 = vmul.f32 (!%p598_p9), %v411_v26, %v411_v26 }
  0x5c   : > { %v422_v29 = vmul.f32 (!%p598_p9), -0.5, %v419_v27  ;;  %v420_v32 = vld [vmem:[%s1008_s2] sm:$0x3] (!%p598_p9)  ;;  %v428_v37 = vmul.f32 (!%p598_p9), 0.5, %v419_v27 }
  0x5d   : > { %v364_v10 = vcombine.high %v361_v8, %v361_v8  ;;  %v370_v11 = vsub.s32 %v367_v9, %v369_v7  ;;  %v414_v30 = vsel (!%p598_p9), %vm413_vm3, %v412_v28, 0.0  ;;  %v421_v33 = vsub.f32 (!%p598_p9), %v411_v26, %v420_v32 }
  0x5e   : > { %v423_v31 = vmul.f32 (!%p598_p9), 1.442695, %v422_v29 }
  0x5f   : > { %v371_v12 = vrot.slane %v361_v8, %v370_v11  ;;  %v378_v13 = vrot.slane %v364_v10, %v370_v11 }
  0x60   : > { %667 = vpow2.f32 (!%p598_p9), %v423_v31 }
  0x61   : > { %v379_v14 = vcombine.high %v371_v12, %v371_v12  ;;  %v380_v15 = vcombine.high %v378_v13, %v378_v13  ;;  %v386_v16 = vsel %vm385_vm1, %v371_v12, 0.0  ;;  %v389_v18 = vsel %vm385_vm1, %v378_v13, 0.0 }
  0x63   : > { %v387_v17 = vsel %vm385_vm1, %v379_v14, 0.0  ;;  %v391_v20 = vsel %vm385_vm1, %v380_v15, 0.0 }
  0x64   : > { %v388_v19 = vadd.f32 %v387_v17, %v386_v16 }
  0x66   : > { %v390_v21 = vadd.f32 %v389_v18, %v388_v19 }
  0x68   : > { %v392_v22 = vadd.f32 %v391_v20, %v390_v21 }
  0x6a   : > { %393 = vadd.xlane.f32.xlu0 %v392_v22  ;;  %v668_v34 = vpop.eup (!%p598_p9), %667 }
  0x6b   : > { %v425_v35 = vmul.f32 (!%p598_p9), %v668_v34, %v421_v33 }
  0x6d   : > { %v426_v36 = vmul.f32 (!%p598_p9), 0.5, %v425_v35 }
  0x6e   : > { %415 = vadd.xlane.f32.xlu0 (!%p598_p9), %v414_v30 }
  0x6f   : > { %v427_v38 = vmul.f32 (!%p598_p9), %v426_v36, %v425_v35 }
  0x71   : > { %v429_v39 = vadd.f32 (!%p598_p9), %v428_v37, %v427_v38 }
  0x73   : > { %v430_v40 = vadd.f32 (!%p598_p9), 1.9586593, %v429_v39 }
  0x75   : > { %v431_v41 = vsel (!%p598_p9), %vm413_vm3, %v430_v40, 0.0 }
  0x76   : > { %432 = vadd.xlane.f32.xlu0 (!%p598_p9), %v431_v41 }
  0xf4   : > { %401 = sbr.rel (%p598_p9) target bundleno = 280 (0x118), region = 56 }
  0xf7   : > { %v394_v24 = vpop.xlane.xlu0 %393 }
  0xf8   : > { %v395_v25 = vadd.f32 %v394_v24, %v362_v23 }
  0xfa   : > { %397 = vst.msk [vmem:[#allocation2] sm:$0x3] %vm396_vm2, %v395_v25 }
  0xfb   : > { %v416_v45 = vpop.xlane.xlu0 %415 }
  0xfc   : > { %v417_v48 = vmul.f32 -0.5, %v416_v45 }
  0xfe   : > { %v599_v51 = vadd.f32 -7.351508, %v417_v48 }
 0x101   : > { %v402_v42 = vld [vmem:[#allocation2] sm:$0x3] }
 0x102   : > { %669 = vrsqrt.f32 %v402_v42  ;;  %vm405_vm4 = vcmp.eq.f32.partialorder %v402_v42, inf  ;;  %v408_v46 = vand.u32 2147483648, %v402_v42  ;;  %vm407_vm5 = vcmp.eq.f32.partialorder %v402_v42, 0.0 }
 0x103   : > { %v433_v53 = vpop.xlane.xlu0 %432 }
 0x104   : > { %v434_v54 = vsub.f32 0.0, %v433_v53 }
 0x10c   : > { %v670_v43 = vpop.eup %669 }
 0x10d   : > { %v404_v44 = vmul.f32 %v670_v43, %v402_v42 }
 0x10f   : > { %v406_v47 = vsel %vm405_vm4, %v402_v42, %v404_v44 }
 0x110   : > { %v409_v49 = vsel %vm407_vm5, %v408_v46, %v406_v47 }
 0x111   : > { %v410_v50 = vsub.f32 0.0, %v409_v49 }
 0x113   : > { %v435_v52 = vadd.f32 %v599_v51, %v410_v50 }
 0x115   : > { %v436_v55 = vsub.f32 %v435_v52, %v434_v54 }
 0x117   : > { %437 = vst.msk [vmem:[%s1011_s5] sm:$0x3] %vm396_vm2, %v436_v55 }
 0x118 PF: > { %s21_s23 = sadd.s32 1, %s785_s23   ;;  %s1021_s18 = smov %s769_s19 }
 0x119   : > { %p18_p6 = scmp.ge.s32.totalorder %s21_s23, 4   ;;  %s1022_s19 = smov %s773_s20 }
 0x11a   : > { %s1023_s20 = smov %s870_s30  ;;  %s1024_s21 = smov %s781_s22 }
 0x11b   : > { %s1025_s22 = smov %s1027_s25  ;;  %20 = sbr.rel (!%p18_p6) target bundleno = 6 (0x6), region = 110 }
 0x122   :  { %457 = vsyncpa [#allocation4], 1 }
 0x123   :  { %459 = vsyncpa [#allocation4 + $0x1], 1 }
 0x124   :  { %460 = vsyncpa [#allocation6], 1 }
 0x125   :  { %462 = vsyncpa [#allocation6 + $0x1], 1 }

</bundles_post_ra>
